<compile_context>
chip_gen: v7x
topology: tpu7x:2x2x1
jax: 0.10.0
libtpu: 0.0.40
codegen_flags: <defaults>
</compile_context>

<pallas_src>
import math

import jax
import jax.numpy as jnp
from jax.experimental import pallas as pl
from jax.experimental.pallas import tpu as pltpu

_LANE_CHOICES = (1024, 512, 256, 128)
_MAX_BLOCK_BYTES = 8 * 1024 * 1024     # per-buffer tile cap (v5e/v6e/v7x safe)
_VMEM_LIMIT_CAP = 40 * 1024 * 1024     # leaves headroom under v7x 64 MiB/TC
_VMEM_LIMIT_FLOOR = 16 * 1024 * 1024


def _sublane_pack(dtype) -> int:
    """Packed sublane tile height: 8 for 4-byte, 16 for 2-byte, 32 for 1-byte."""
    itemsize = jnp.dtype(dtype).itemsize
    return max(8, 32 // max(1, itemsize))


def _round_up(x: int, m: int) -> int:
    return (x + m - 1) // m * m


def _copy_kernel(x_ref, o_ref):
    # Identity copy of the current (block_rows, lanes) tile.  Pure DMA-bound.
    o_ref[...] = x_ref[...]


def _resolve_shape(total: int, shape):
    """Resolve a torch.view-style shape (allowing one -1)."""
    shape = list(shape)
    neg = [i for i, s in enumerate(shape) if s == -1]
    if len(neg) > 1:
        raise ValueError("only one dimension can be -1")
    if neg:
        known = 1
        for i, s in enumerate(shape):
            if i != neg[0]:
                known *= s
        # NOTE: diverges from torch.view only in zero-sized-dim + -1 edge cases.
        if known == 0 or total % known != 0:
            raise ValueError(f"cannot reshape {total} elements into {shape}")
        shape[neg[0]] = total // known
    if math.prod(shape) != total:
        raise ValueError(f"cannot reshape {total} elements into {shape}")
    return tuple(shape)


def pallas_reshape(x, *target_shape, materialize=True):
    """Equivalent of Reshape(*target_shape)(x) == x.view(target_shape)."""
    # Accept both Reshape(2, -1) and Reshape((2, -1)) conventions.
    if len(target_shape) == 1 and isinstance(target_shape[0], (tuple, list)):
        target_shape = tuple(target_shape[0])

    total = x.size
    out_shape = _resolve_shape(total, target_shape)

    # A view requires zero bytes of data movement; when the caller does not
    # need a materialized copy this is the honest fastest path on every chip.
    if not materialize or total == 0:
        return jnp.reshape(x, out_shape)

    # Widest lane-dense last dim that divides the element count.
    lanes = next((l for l in _LANE_CHOICES if total % l == 0), None)
    if lanes is None:
        # TODO(synk): fold the <128-element ragged tail into a masked last
        # block in-kernel; the metadata-only reshape below avoids the old
        # pad + slice path that paid ~3x the HBM traffic.
        return jnp.reshape(x, out_shape)

    dtype = x.dtype
    itemsize = jnp.dtype(dtype).itemsize
    pack = _sublane_pack(dtype)
    n_rows = total // lanes
    flat2d = jnp.reshape(x, (n_rows, lanes))

    if n_rows <= pack:
        # Tiny array: single full-extent block (allowed since it equals the dim).
        block_rows = n_rows
    else:
        max_rows_by_vmem = max(
            pack, (_MAX_BLOCK_BYTES // (lanes * itemsize)) // pack * pack
        )
        # >= 2 blocks whenever the array spans more than one packed tile so the
        # "parallel" grid axis can shard across both TensorCores on v7x.
        target_rows = _round_up(-(-n_rows // 2), pack)
        block_rows = max(pack, min(max_rows_by_vmem, target_rows))

    grid = (pl.cdiv(n_rows, block_rows),)

    # Double-buffered input + output (+ margin), floored at the v5e scoped
    # default and capped so v7x's 64 MiB/TC keeps headroom for neighbors.
    block_bytes = block_rows * lanes * itemsize
    vmem_limit = int(
        min(_VMEM_LIMIT_CAP, max(_VMEM_LIMIT_FLOOR, 4 * block_bytes + (2 << 20)))
    )

    out2d = pl.pallas_call(
        _copy_kernel,
        out_shape=jax.ShapeDtypeStruct((n_rows, lanes), dtype),
        grid_spec=pltpu.PrefetchScalarGridSpec(
            num_scalar_prefetch=0,
            grid=grid,
            in_specs=[pl.BlockSpec((block_rows, lanes), lambda i: (i, 0))],
            out_specs=pl.BlockSpec((block_rows, lanes), lambda i: (i, 0)),
        ),
        compiler_params=pltpu.CompilerParams(
            dimension_semantics=("parallel",),
            vmem_limit_bytes=vmem_limit,
        ),
        # Alias the output onto the input buffer: under jit (and with the
        # caller donating x) the identity copy needs no second HBM array.
        input_output_aliases={0: 0},
    )(flat2d)

    return out2d.reshape(out_shape)


if __name__ == "__main__":
    key = jax.random.PRNGKey(0)

    # Primary case: small NCHW-like feature map (VAE-style), Reshape(2, -1).
    x = jax.random.normal(key, (2, 4, 16, 16), dtype=jnp.float32)
    ref = jnp.reshape(x, (2, -1))
    out = jax.block_until_ready(jax.jit(lambda a: pallas_reshape(a, 2, -1))(x))
    assert out.shape == ref.shape and out.dtype == ref.dtype
    assert bool(jnp.all(out == ref))

    # bf16 case (exercises dtype-aware sublane packing + wide 1024-lane slab).
    xb = jax.random.normal(key, (2, 4, 16, 16), dtype=jnp.bfloat16)
    refb = jnp.reshape(xb, (8, -1))
    outb = jax.block_until_ready(jax.jit(lambda a: pallas_reshape(a, 8, -1))(xb))
    assert outb.shape == refb.shape and outb.dtype == refb.dtype
    assert bool(jnp.all(outb == refb))

    # Larger case: multi-block grid (>= 2 parallel blocks for v7x megacore).
    xl = jax.random.normal(key, (8, 64, 128), dtype=jnp.float32)
    refl = jnp.reshape(xl, (64, -1))
    outl = jax.block_until_ready(jax.jit(lambda a: pallas_reshape(a, 64, -1))(xl))
    assert outl.shape == refl.shape and outl.dtype == refl.dtype
    assert bool(jnp.all(outl == refl))

    # Ragged case (total % 128 != 0): metadata-only fallback, no pad/slice.
    xr = jax.random.normal(key, (3, 5, 7), dtype=jnp.float32)
    refr = jnp.reshape(xr, (-1,))
    outr = jax.block_until_ready(pallas_reshape(xr, -1))
    assert outr.shape == refr.shape and outr.dtype == refr.dtype
    assert bool(jnp.all(outr == refr))

    print("KERNEL_OK")
</pallas_src>

<mosaic_0001>
module attributes {stable_mosaic.version = 11 : i64} {
  func.func @_copy_kernel(%arg0: i32, %arg1: memref<2x1024xf32, #tpu.memory_space<vmem>>, %arg2: memref<2x1024xf32, #tpu.memory_space<vmem>>) attributes {dimension_semantics = [#tpu.dimension_semantics<parallel>], iteration_bounds = array<i64: 1>, scalar_prefetch = 0 : i64, scratch_operands = 0 : i64, tpu.core_type = #tpu.core_type<tc>, window_params = [{transform_indices = @transform_0, window_bounds = array<i64: 2, 1024>}, {transform_indices = @transform_1, window_bounds = array<i64: 2, 1024>}]} {
    %c0 = arith.constant 0 : index
    %c0_0 = arith.constant 0 : index
    %0 = vector.load %arg1[%c0, %c0_0] : memref<2x1024xf32, #tpu.memory_space<vmem>>, vector<2x1024xf32>
    %c0_1 = arith.constant 0 : index
    %c0_2 = arith.constant 0 : index
    %1 = vector.load %arg2[%c0_1, %c0_2] : memref<2x1024xf32, #tpu.memory_space<vmem>>, vector<2x1024xf32>
    tpu.vector_store %arg2[%c0_1, %c0_2], %0 {strides = array<i32>} : memref<2x1024xf32, #tpu.memory_space<vmem>>, vector<2x1024xf32>,
    return
  }
  func.func @transform_0(%arg0: i32) -> (i32, i32) {
    %c0_i32 = arith.constant 0 : i32
    %c0_i32_0 = arith.constant 0 : i32
    return %arg0, %c0_i32 : i32, i32
  }
  func.func @transform_1(%arg0: i32) -> (i32, i32) {
    %c0_i32 = arith.constant 0 : i32
    %c0_i32_0 = arith.constant 0 : i32
    return %arg0, %c0_i32 : i32, i32
  }
}

</mosaic_0001>

<bundles_post_ra>
// kernel: _lambda_.1
= control target key start
LH: loop header
LB: loop body
LE: loop exit
PB: predicated region body
PF: predicated region fallthrough
CT: control target
= control target key end

     0   :  { %6 = vsyncpa [#allocation3], 0  ;;  %s126_s0 = inlined_call_operand.hbm [shape: f32[2,1024], index: 0, kind: input, shape index: {}, may-alias: {0,1}]   ;;  %s127_s1 = inlined_call_operand.hbm [shape: f32[2,1024], index: 1, kind: output, shape index: {}, may-alias: {0,1}]  }
   0x1   :  { %7 = vsyncpa [#allocation4], 0  ;;  %s90_s6 = smov [#allocation2]   ;;  %s42_s10 = scalar_lea.hbm %s126_s0, 256 }
   0x2   :  { %s14_s7 = sshll.u32 %s90_s6, 4  ;;  %p43_p0 = scmp.ne.s32.totalorder %s126_s0, %s42_s10  ;;  %s15_s7 = int_to_ptr.vmem [resolvable:$true] %s14_s7 }
   0x3   :  { %p46_p1 = scmp.lt.u32.totalorder %s42_s10, %s126_s0 }
   0x5   :  { %p48_p2 = pnand %p46_p1, %p43_p0 }
   0x7   :  { %51 = shalt.err (!%p48_p2)
}
   0x8   :  { %s52_s15 = scalar_lea.vmem %s15_s7, 256  ;;  %p57_p4 = scmp.lt.s32.totalorder %s15_s7, %s15_s7 }
   0x9   :  { %p53_p3 = scmp.ne.s32.totalorder %s15_s7, %s52_s15  ;;  %p58_p5 = scmp.lt.s32.totalorder %s52_s15, %s52_s15 }
   0xb   :  { %p59_p6 = por %p58_p5, %p57_p4 }
   0xd   :  { %p60_p7 = pnand %p59_p6, %p53_p3 }
   0xf   :  { %63 = shalt.err (!%p60_p7)
}
  0x10   :  { %17 = dma.hbm_to_vmem [thread:$0]  %s126_s0, 256, %s15_s7, [#allocation3]  }
  0x11   :  { %86 = dma.done.wait [#allocation3], 256  }
  0x12   :  { %87 = vsyncadd [#allocation3], 4294967040  ;;  %s91_s18 = smov [#allocation5]   ;;  %v21_v0 = vld [vmem:[#allocation2] sm:$0xff]  ;;  %v22_v1 = vld [vmem:[#allocation2 + $0x8] sm:$0xff] }
  0x13   :  { %s31_s19 = sshll.u32 %s91_s18, 4  ;;  %23 = vst [vmem:[#allocation5] sm:$0xff] %v21_v0  ;;  %24 = vst [vmem:[#allocation5 + $0x8] sm:$0xff] %v22_v1  ;;  %s32_s19 = int_to_ptr.vmem [resolvable:$true] %s31_s19 }
  0x14   :  { %s64_s20 = scalar_lea.vmem %s32_s19, 256  ;;  %p69_p9 = scmp.lt.s32.totalorder %s32_s19, %s32_s19 }
  0x15   :  { %p65_p8 = scmp.ne.s32.totalorder %s32_s19, %s64_s20  ;;  %p70_p10 = scmp.lt.s32.totalorder %s64_s20, %s64_s20 }
  0x17   :  { %p71_p11 = por %p70_p10, %p69_p9 }
  0x19   :  { %p72_p12 = pnand %p71_p11, %p65_p8 }
  0x1b   :  { %75 = shalt.err (!%p72_p12)
}
  0x1c   :  { %s76_s0 = scalar_lea.hbm %s127_s1, 256 }
  0x1d   :  { %p77_p13 = scmp.ne.s32.totalorder %s127_s1, %s76_s0  ;;  %p80_p0 = scmp.lt.u32.totalorder %s76_s0, %s127_s1 }
  0x1f   :  { %p82_p1 = pnand %p80_p0, %p77_p13 }
  0x21   :  { %85 = shalt.err (!%p82_p1)
}
  0x22   :  { %34 = dma.vmem_to_hbm [thread:$0]  %s32_s19, 256, %s127_s1, [#allocation4]  }
  0x23   :  { %88 = dma.done.wait [#allocation4], 256  }
  0x24   :  { %89 = vsyncadd [#allocation4], 4294967040 }
  0x25   :  { %38 = vsyncpa [#allocation3], 1 }
  0x26   :  { %39 = vsyncpa [#allocation4], 1 }

</bundles_post_ra>
